<compile_context>
chip_gen: v7x
topology: tpu7x:2x2x1
jax: 0.10.0
libtpu: 0.0.40
codegen_flags: <defaults>
</compile_context>

<pallas_src>
import math

import jax
import jax.numpy as jnp
import numpy as np
from jax.experimental import pallas as pl
from jax.experimental.pallas import tpu as pltpu

PHI = (1.0 + math.sqrt(5.0)) / 2.0
NUM_EXPERTS = 8  # len(ExpertSpecialization)

# --- packed-slab layout constants -------------------------------------------------
_UNC_ROWS = 16                           # wu1 rows (E) padded to bf16 sublane tile
_C1A_LO = _UNC_ROWS                      # 16: start of wc1[:4E] rows in w256 slab
_C1A_HI = _C1A_LO + 4 * NUM_EXPERTS      # 48
_C1B_HI = _C1A_HI + 64                   # 112: end of wc1[4E:] rows
_HEAD_W = 64                             # fused head padded to 64 output columns

# bias slab (1, 1024) f32, every segment starts at a 128-lane boundary
_B_U1 = (0, 256)       # uncertainty_integrator L1 bias (256)
_B_U2 = (256, 384)     # L2 bias (128)
_B_U3 = (384, 448)     # L3 bias (64)                         [448:512) zero pad
_B_C1 = (512, 768)     # consensus_predictor L1 bias (256)
_B_C2 = (768, 896)     # L2 bias (128)
_B_HD = (896, 960)     # fused head bias: bc3(4) | bcf(1) | zeros
_BIAS_LEN = 1024

# packed output layout (1, 128) f32
#   [0:4]   sigmoid(consensus logits)
#   [4:5]   sigmoid(confidence)
#   [64:68] phi-weighted sums [validity, unity, phi, consciousness]
_OUT_LEN = 128


# ----------------------------------------------------------------------------
# Pallas kernel
# ----------------------------------------------------------------------------
def _consensus_kernel(
    sc4_ref,     # (1, 4E)  f32: [validity | unity | phi | consciousness] scores
    unc_ref,     # (1, 16)  f32: uncertainty scores, zero-padded past E
    wsum_w_ref,  # (4E, 64) f32: block-diag (ew*pcw) selector, cols 0:4 real
    bias_ref,    # (1, 1024) f32: all biases, 128-aligned segments
    w256_ref,    # (112, 256) bf16: [wu1 pad16 ; wc1]
    w128_ref,    # (512, 128) bf16: [wu2 ; wc2]
    w64_ref,     # (256, 64)  bf16: [wu3 ; (wc3|wcf|0) fused head]
    out_ref,     # (1, 128)   f32 packed output slab
):
    f32, bf16 = jnp.float32, jnp.bfloat16
    bias = bias_ref[...]          # one load; slices below are register-level views
    sc4 = sc4_ref[...]
    unc = unc_ref[...]

    # --- uncertainty_integrator: Linear(E,256)-ReLU-Linear(256,128)-ReLU-Linear(128,64)-Sigmoid
    h = jnp.dot(unc.astype(bf16), w256_ref[0:_UNC_ROWS, :],
                preferred_element_type=f32) + bias[:, _B_U1[0]:_B_U1[1]]
    h = jnp.maximum(h, 0.0)
    h = jnp.dot(h.astype(bf16), w128_ref[0:256, :],
                preferred_element_type=f32) + bias[:, _B_U2[0]:_B_U2[1]]
    h = jnp.maximum(h, 0.0)
    ufeat = jax.nn.sigmoid(
        jnp.dot(h.astype(bf16), w64_ref[0:128, :],
                preferred_element_type=f32) + bias[:, _B_U3[0]:_B_U3[1]]
    )  # (1, 64)

    # --- phi-harmonic weighted sums, exact f32, written straight into packed output
    wsum = jnp.dot(sc4, wsum_w_ref[...], preferred_element_type=f32)  # (1, 64), cols 0:4 real

    # --- consensus_predictor on cat([validity, unity, phi, consc, ufeat]) ---
    # concat @ W1 expressed as two matmuls over row-blocks of the packed W1 slab.
    z = jnp.dot(sc4.astype(bf16), w256_ref[_C1A_LO:_C1A_HI, :], preferred_element_type=f32)
    z = z + jnp.dot(ufeat.astype(bf16), w256_ref[_C1A_HI:_C1B_HI, :], preferred_element_type=f32)
    h1 = jnp.maximum(z + bias[:, _B_C1[0]:_B_C1[1]], 0.0)   # (1,256); Dropout(0.1) identity (eval)
    h2 = jnp.maximum(
        jnp.dot(h1.astype(bf16), w128_ref[256:512, :],
                preferred_element_type=f32) + bias[:, _B_C2[0]:_B_C2[1]], 0.0
    )  # (1, 128)

    # --- fused heads: cols 0:4 = consensus logits, col 4 = confidence, rest zero pad
    # TODO(synk): original applies nn.Linear(256,1) to this 128-dim tensor (shape bug
    # that would raise in PyTorch); implemented as the evident intent, Linear(128,1).
    head = jax.nn.sigmoid(
        jnp.dot(h2.astype(bf16), w64_ref[128:256, :],
                preferred_element_type=f32) + bias[:, _B_HD[0]:_B_HD[1]]
    )  # (1, 64)

    # two width-64 stores fully cover the single lane-dense (1,128) output slab
    out_ref[:, 0:64] = head
    out_ref[:, 64:128] = wsum


# ----------------------------------------------------------------------------
# pallas_call wrapper (jitted; builds the tiny per-call tensors on device)
# ----------------------------------------------------------------------------
@jax.jit
def consensus_pallas(scores4, unc, expert_weights, phi_consensus_weights, packed):
    """scores4: (4, E) rows [validity, unity, phi, consciousness]; unc, ew, pcw: (E,)."""
    E = scores4.shape[1]
    f32 = jnp.float32

    sc4 = scores4.astype(f32).reshape(1, 4 * E)
    unc16 = jnp.pad(unc.astype(f32), (0, _UNC_ROWS - E)).reshape(1, _UNC_ROWS)

    # block-diagonal selector so that (1,4E) @ (4E,64) -> [sum_e score_j[e]*w[e]] in col j
    w = (expert_weights * phi_consensus_weights).astype(f32)            # (E,)
    sel = jnp.pad(jnp.eye(4, dtype=f32), ((0, 0), (0, _HEAD_W - 4)))    # (4, 64)
    wsum_w = (w[None, :, None] * sel[:, None, :]).reshape(4 * E, _HEAD_W)

    vmem = pltpu.MemorySpace.VMEM
    return pl.pallas_call(
        _consensus_kernel,
        out_shape=jax.ShapeDtypeStruct((1, _OUT_LEN), f32),
        in_specs=[pl.BlockSpec(memory_space=vmem)] * 7,
        out_specs=pl.BlockSpec(memory_space=vmem),
    )(sc4, unc16, wsum_w, packed["bias"], packed["w256"], packed["w128"], packed["w64"])


# ----------------------------------------------------------------------------
# Parameter init (PyTorch nn.Linear-style uniform) + packing into slabs
# ----------------------------------------------------------------------------
def _linear(key, fan_in, fan_out):
    kw, kb = jax.random.split(key)
    bound = 1.0 / math.sqrt(fan_in)
    w = jax.random.uniform(kw, (fan_in, fan_out), jnp.float32, -bound, bound)
    b = jax.random.uniform(kb, (1, fan_out), jnp.float32, -bound, bound)
    return w, b


def init_raw_params(key, num_experts=NUM_EXPERTS):
    ks = jax.random.split(key, 7)
    p = {}
    p["wu1"], p["bu1"] = _linear(ks[0], num_experts, 256)
    p["wu2"], p["bu2"] = _linear(ks[1], 256, 128)
    p["wu3"], p["bu3"] = _linear(ks[2], 128, 64)
    p["wc1"], p["bc1"] = _linear(ks[3], num_experts * 4 + 64, 256)
    p["wc2"], p["bc2"] = _linear(ks[4], 256, 128)
    p["wc3"], p["bc3"] = _linear(ks[5], 128, 4)
    p["wcf"], p["bcf"] = _linear(ks[6], 128, 1)   # confidence head (see kernel TODO)
    return p


def pack_params(raw, num_experts=NUM_EXPERTS):
    """Pack per-layer params into 3 bf16 weight slabs + 1 f32 bias slab."""
    E = num_experts
    assert (4 * E) % 16 == 0 and E <= _UNC_ROWS, "packing assumes bf16 16-row alignment"
    bf16, f32 = jnp.bfloat16, jnp.float32

    w256 = jnp.concatenate(
        [jnp.pad(raw["wu1"], ((0, _UNC_ROWS - E), (0, 0))), raw["wc1"]], axis=0
    ).astype(bf16)                                                        # (112, 256)
    w128 = jnp.concatenate([raw["wu2"], raw["wc2"]], axis=0).astype(bf16)  # (512, 128)
    head = jnp.pad(jnp.concatenate([raw["wc3"], raw["wcf"]], axis=1),
                   ((0, 0), (0, _HEAD_W - 5)))                             # (128, 64)
    w64 = jnp.concatenate([raw["wu3"], head], axis=0).astype(bf16)         # (256, 64)

    def seg(v, width):
        v = v.reshape(-1)
        return jnp.pad(v, (0, width - v.shape[0]))

    bias = jnp.concatenate([
        seg(raw["bu1"], 256), seg(raw["bu2"], 128), seg(raw["bu3"], 128),
        seg(raw["bc1"], 256), seg(raw["bc2"], 128),
        seg(jnp.concatenate([raw["bc3"].reshape(-1), raw["bcf"].reshape(-1)]), 128),
    ]).reshape(1, _BIAS_LEN).astype(f32)

    return {"w256": w256, "w128": w128, "w64": w64, "bias": bias}


# ----------------------------------------------------------------------------
# Forward glue mirroring ConsensusValidator.forward (single device->host transfer)
# ----------------------------------------------------------------------------
def _empty_consensus():
    return {"consensus_validity": 0.0, "consensus_unity": 0.0,
            "consensus_phi_resonance": 0.0, "consensus_consciousness": 0.0,
            "consensus_confidence": 0.0, "expert_agreement": 0.0,
            "weighted_validity": 0.0, "weighted_unity": 0.0,
            "expert_weights_used": []}


def consensus_validator_forward(pred_scores, expert_weights, phi_consensus_weights,
                                packed_params, num_experts=NUM_EXPERTS):
    """pred_scores: dict of 1-D arrays (len = number of participating experts)."""
    # Host staging (reference builds these from Python floats via torch.tensor).
    ps = {k: np.asarray(v, dtype=np.float32) for k, v in pred_scores.items()}
    ew_np = np.asarray(expert_weights, dtype=np.float32)
    n = ps["validity"].shape[0]
    if n == 0:
        return _empty_consensus()

    pad = num_experts - n

    def pad1(x, value):
        return np.pad(x, (0, pad), constant_values=value) if pad > 0 else x

    validity = pad1(ps["validity"], 0.0)
    unity = pad1(ps["unity"], 0.0)
    phi_r = pad1(ps["phi"], 0.0)
    consc = pad1(ps["consciousness"], 0.0)
    unc = pad1(ps["uncertainty"], 1.0)
    ew = pad1(ew_np, 0.0)

    scores4 = jnp.asarray(np.stack([validity, unity, phi_r, consc], axis=0))  # (4, E)

    packed_out = consensus_pallas(scores4, jnp.asarray(unc), jnp.asarray(ew),
                                  phi_consensus_weights, packed_params)
    out = np.asarray(packed_out)[0]   # the ONLY device->host transfer

    # expert agreement (plain numpy, as in the reference)
    if n < 2:
        agreement = 1.0
    else:
        v_std = float(np.std(ps["validity"]))
        u_std = float(np.std(ps["unity"]))
        agreement = 1.0 - min(1.0, (v_std + u_std) / 2.0)

    # TODO(synk): consensus_reasoning / participating_experts string bookkeeping of the
    # reference is pure Python with no tensor content and is omitted here.
    return {
        "consensus_validity": float(out[0]),
        "consensus_unity": float(out[1]),
        "consensus_phi_resonance": float(out[2]),
        "consensus_consciousness": float(out[3]),
        "consensus_confidence": float(out[4]),
        "expert_agreement": agreement,
        "weighted_validity": float(out[64]),
        "weighted_unity": float(out[65]),
        "expert_weights_used": ew.tolist(),
    }


# ----------------------------------------------------------------------------
if __name__ == "__main__":
    key = jax.random.PRNGKey(0)
    k_param, k_data = jax.random.split(key)

    raw_params = init_raw_params(k_param, NUM_EXPERTS)
    packed_params = pack_params(raw_params, NUM_EXPERTS)
    phi_consensus_weights = jnp.ones((NUM_EXPERTS,), jnp.float32) / PHI

    # 5 participating experts (padded up to NUM_EXPERTS=8 inside the glue)
    num_present = 5
    kd = jax.random.split(k_data, 6)
    pred_scores = {
        "validity": jax.random.uniform(kd[0], (num_present,), jnp.float32),
        "unity": jax.random.uniform(kd[1], (num_present,), jnp.float32),
        "phi": jax.random.uniform(kd[2], (num_present,), jnp.float32),
        "consciousness": jax.random.uniform(kd[3], (num_present,), jnp.float32, 0.0, 2.0),
        "uncertainty": jax.random.uniform(kd[4], (num_present,), jnp.float32),
    }
    expert_weights = jax.nn.softmax(jax.random.normal(kd[5], (num_present,), jnp.float32))

    result = consensus_validator_forward(
        pred_scores, expert_weights, phi_consensus_weights, packed_params
    )
    jax.block_until_ready(jnp.asarray(result["consensus_validity"]))
    print("KERNEL_OK")
</pallas_src>

<mosaic_0001>
module attributes {stable_mosaic.version = 11 : i64} {
  func.func @_consensus_kernel(%arg0: memref<1x32xf32, #tpu.memory_space<vmem>>, %arg1: memref<1x16xf32, #tpu.memory_space<vmem>>, %arg2: memref<32x64xf32, #tpu.memory_space<vmem>>, %arg3: memref<1x1024xf32, #tpu.memory_space<vmem>>, %arg4: memref<112x256xbf16, #tpu.memory_space<vmem>>, %arg5: memref<512x128xbf16, #tpu.memory_space<vmem>>, %arg6: memref<256x64xbf16, #tpu.memory_space<vmem>>, %arg7: memref<1x128xf32, #tpu.memory_space<vmem>>) attributes {dimension_semantics = [], scalar_prefetch = 0 : i64, scratch_operands = 0 : i64, tpu.core_type = #tpu.core_type<tc>} {
    %c0 = arith.constant 0 : index
    %c0_0 = arith.constant 0 : index
    %0 = vector.load %arg3[%c0, %c0_0] : memref<1x1024xf32, #tpu.memory_space<vmem>>, vector<1x1024xf32>
    %c0_1 = arith.constant 0 : index
    %c0_2 = arith.constant 0 : index
    %1 = vector.load %arg0[%c0_1, %c0_2] : memref<1x32xf32, #tpu.memory_space<vmem>>, vector<1x32xf32>
    %c0_3 = arith.constant 0 : index
    %c0_4 = arith.constant 0 : index
    %2 = vector.load %arg1[%c0_3, %c0_4] : memref<1x16xf32, #tpu.memory_space<vmem>>, vector<1x16xf32>
    %3 = arith.truncf %2 : vector<1x16xf32> to vector<1x16xbf16>
    %c0_5 = arith.constant 0 : index
    %c0_6 = arith.constant 0 : index
    %4 = vector.load %arg4[%c0_5, %c0_6] : memref<112x256xbf16, #tpu.memory_space<vmem>>, vector<16x256xbf16>
    %cst = arith.constant dense<0.000000e+00> : vector<1x256xf32>
    %5 = tpu.matmul %3, %4, %cst {dimension_numbers = #tpu.dot_dimension_numbers<[1], [0], [0], [1], [0, 0, 1, 1], [], []>} : vector<1x16xbf16>, vector<16x256xbf16>, vector<1x256xf32> -> vector<1x256xf32>
    %6 = vector.extract_strided_slice %0 {offsets = [0, 0], sizes = [1, 256], strides = [1, 1]} : vector<1x1024xf32> to vector<1x256xf32>
    %7 = arith.addf %5, %6 : vector<1x256xf32>
    %cst_7 = arith.constant 0.000000e+00 : f32
    %8 = vector.broadcast %cst_7 : f32 to vector<1x256xf32>
    %9 = arith.maximumf %7, %8 : vector<1x256xf32>
    %10 = arith.truncf %9 : vector<1x256xf32> to vector<1x256xbf16>
    %c0_8 = arith.constant 0 : index
    %c0_9 = arith.constant 0 : index
    %11 = vector.load %arg5[%c0_8, %c0_9] : memref<512x128xbf16, #tpu.memory_space<vmem>>, vector<256x128xbf16>
    %cst_10 = arith.constant dense<0.000000e+00> : vector<1x128xf32>
    %12 = tpu.matmul %10, %11, %cst_10 {dimension_numbers = #tpu.dot_dimension_numbers<[1], [0], [0], [1], [0, 0, 1, 1], [], []>} : vector<1x256xbf16>, vector<256x128xbf16>, vector<1x128xf32> -> vector<1x128xf32>
    %13 = vector.extract_strided_slice %0 {offsets = [0, 256], sizes = [1, 128], strides = [1, 1]} : vector<1x1024xf32> to vector<1x128xf32>
    %14 = arith.addf %12, %13 : vector<1x128xf32>
    %cst_11 = arith.constant 0.000000e+00 : f32
    %15 = vector.broadcast %cst_11 : f32 to vector<1x128xf32>
    %16 = arith.maximumf %14, %15 : vector<1x128xf32>
    %17 = arith.truncf %16 : vector<1x128xf32> to vector<1x128xbf16>
    %c0_12 = arith.constant 0 : index
    %c0_13 = arith.constant 0 : index
    %18 = vector.load %arg6[%c0_12, %c0_13] : memref<256x64xbf16, #tpu.memory_space<vmem>>, vector<128x64xbf16>
    %cst_14 = arith.constant dense<0.000000e+00> : vector<1x64xf32>
    %19 = tpu.matmul %17, %18, %cst_14 {dimension_numbers = #tpu.dot_dimension_numbers<[1], [0], [0], [1], [0, 0, 1, 1], [], []>} : vector<1x128xbf16>, vector<128x64xbf16>, vector<1x64xf32> -> vector<1x64xf32>
    %20 = vector.extract_strided_slice %0 {offsets = [0, 384], sizes = [1, 64], strides = [1, 1]} : vector<1x1024xf32> to vector<1x64xf32>
    %21 = arith.addf %19, %20 : vector<1x64xf32>
    %22 = arith.negf %21 : vector<1x64xf32>
    %23 = math.exp %22 : vector<1x64xf32>
    %cst_15 = arith.constant 1.000000e+00 : f32
    %24 = vector.broadcast %cst_15 : f32 to vector<1x64xf32>
    %25 = arith.addf %24, %23 : vector<1x64xf32>
    %26 = arith.divf %24, %25 : vector<1x64xf32>
    %c0_16 = arith.constant 0 : index
    %c0_17 = arith.constant 0 : index
    %27 = vector.load %arg2[%c0_16, %c0_17] : memref<32x64xf32, #tpu.memory_space<vmem>>, vector<32x64xf32>
    %cst_18 = arith.constant dense<0.000000e+00> : vector<1x64xf32>
    %28 = tpu.matmul %1, %27, %cst_18 {dimension_numbers = #tpu.dot_dimension_numbers<[1], [0], [0], [1], [0, 0, 1, 1], [], []>} : vector<1x32xf32>, vector<32x64xf32>, vector<1x64xf32> -> vector<1x64xf32>
    %29 = arith.truncf %1 : vector<1x32xf32> to vector<1x32xbf16>
    %c16 = arith.constant 16 : index
    %c0_19 = arith.constant 0 : index
    %30 = vector.load %arg4[%c16, %c0_19] : memref<112x256xbf16, #tpu.memory_space<vmem>>, vector<32x256xbf16>
    %cst_20 = arith.constant dense<0.000000e+00> : vector<1x256xf32>
    %31 = tpu.matmul %29, %30, %cst_20 {dimension_numbers = #tpu.dot_dimension_numbers<[1], [0], [0], [1], [0, 0, 1, 1], [], []>} : vector<1x32xbf16>, vector<32x256xbf16>, vector<1x256xf32> -> vector<1x256xf32>
    %32 = arith.truncf %26 : vector<1x64xf32> to vector<1x64xbf16>
    %c48 = arith.constant 48 : index
    %c0_21 = arith.constant 0 : index
    %33 = vector.load %arg4[%c48, %c0_21] : memref<112x256xbf16, #tpu.memory_space<vmem>>, vector<64x256xbf16>
    %cst_22 = arith.constant dense<0.000000e+00> : vector<1x256xf32>
    %34 = tpu.matmul %32, %33, %cst_22 {dimension_numbers = #tpu.dot_dimension_numbers<[1], [0], [0], [1], [0, 0, 1, 1], [], []>} : vector<1x64xbf16>, vector<64x256xbf16>, vector<1x256xf32> -> vector<1x256xf32>
    %35 = arith.addf %31, %34 : vector<1x256xf32>
    %36 = vector.extract_strided_slice %0 {offsets = [0, 512], sizes = [1, 256], strides = [1, 1]} : vector<1x1024xf32> to vector<1x256xf32>
    %37 = arith.addf %35, %36 : vector<1x256xf32>
    %cst_23 = arith.constant 0.000000e+00 : f32
    %38 = vector.broadcast %cst_23 : f32 to vector<1x256xf32>
    %39 = arith.maximumf %37, %38 : vector<1x256xf32>
    %40 = arith.truncf %39 : vector<1x256xf32> to vector<1x256xbf16>
    %c256 = arith.constant 256 : index
    %c0_24 = arith.constant 0 : index
    %41 = vector.load %arg5[%c256, %c0_24] : memref<512x128xbf16, #tpu.memory_space<vmem>>, vector<256x128xbf16>
    %cst_25 = arith.constant dense<0.000000e+00> : vector<1x128xf32>
    %42 = tpu.matmul %40, %41, %cst_25 {dimension_numbers = #tpu.dot_dimension_numbers<[1], [0], [0], [1], [0, 0, 1, 1], [], []>} : vector<1x256xbf16>, vector<256x128xbf16>, vector<1x128xf32> -> vector<1x128xf32>
    %43 = vector.extract_strided_slice %0 {offsets = [0, 768], sizes = [1, 128], strides = [1, 1]} : vector<1x1024xf32> to vector<1x128xf32>
    %44 = arith.addf %42, %43 : vector<1x128xf32>
    %cst_26 = arith.constant 0.000000e+00 : f32
    %45 = vector.broadcast %cst_26 : f32 to vector<1x128xf32>
    %46 = arith.maximumf %44, %45 : vector<1x128xf32>
    %47 = arith.truncf %46 : vector<1x128xf32> to vector<1x128xbf16>
    %c128 = arith.constant 128 : index
    %c0_27 = arith.constant 0 : index
    %48 = vector.load %arg6[%c128, %c0_27] : memref<256x64xbf16, #tpu.memory_space<vmem>>, vector<128x64xbf16>
    %cst_28 = arith.constant dense<0.000000e+00> : vector<1x64xf32>
    %49 = tpu.matmul %47, %48, %cst_28 {dimension_numbers = #tpu.dot_dimension_numbers<[1], [0], [0], [1], [0, 0, 1, 1], [], []>} : vector<1x128xbf16>, vector<128x64xbf16>, vector<1x64xf32> -> vector<1x64xf32>
    %50 = vector.extract_strided_slice %0 {offsets = [0, 896], sizes = [1, 64], strides = [1, 1]} : vector<1x1024xf32> to vector<1x64xf32>
    %51 = arith.addf %49, %50 : vector<1x64xf32>
    %52 = arith.negf %51 : vector<1x64xf32>
    %53 = math.exp %52 : vector<1x64xf32>
    %cst_29 = arith.constant 1.000000e+00 : f32
    %54 = vector.broadcast %cst_29 : f32 to vector<1x64xf32>
    %55 = arith.addf %54, %53 : vector<1x64xf32>
    %56 = arith.divf %54, %55 : vector<1x64xf32>
    %c0_30 = arith.constant 0 : index
    %c0_31 = arith.constant 0 : index
    %57 = vector.load %arg7[%c0_30, %c0_31] : memref<1x128xf32, #tpu.memory_space<vmem>>, vector<1x64xf32>
    tpu.vector_store %arg7[%c0_30, %c0_31], %56 {strides = array<i32>} : memref<1x128xf32, #tpu.memory_space<vmem>>, vector<1x64xf32>,
    %c0_32 = arith.constant 0 : index
    %c64 = arith.constant 64 : index
    %58 = vector.load %arg7[%c0_32, %c64] : memref<1x128xf32, #tpu.memory_space<vmem>>, vector<1x64xf32>
    tpu.vector_store %arg7[%c0_32, %c64], %28 {strides = array<i32>} : memref<1x128xf32, #tpu.memory_space<vmem>>, vector<1x64xf32>,
    return
  }
}

</mosaic_0001>

<bundles_post_ra>
// kernel: mul.8
= control target key start
LH: loop header
LB: loop body
LE: loop exit
PB: predicated region body
PF: predicated region fallthrough
CT: control target
= control target key end

     0   :  { %3 = vsyncpa [#allocation1], 0  ;;  %s126_s0 = inlined_call_operand.hbm [shape: f32[8], index: 0, kind: input, shape index: {}]   ;;  %s127_s1 = inlined_call_operand.hbm [shape: f32[8], index: 1, kind: input, shape index: {}]   ;;  %s128_s2 = inlined_call_operand.vmem [shape: f32[8], index: 2, kind: output, shape index: {}]  }
   0x1   :  { %4 = vsyncpa [#allocation3], 0  ;;  %s82_s9 = smov [#allocation0]   ;;  %s83_s11 = smov [#allocation2]  }
   0x2   :  { %s9_s10 = sshll.u32 %s82_s9, 4  ;;  %s17_s12 = sshll.u32 %s83_s11, 4  ;;  %s10_s10 = int_to_ptr.vmem [resolvable:$true] %s9_s10  ;;  %s18_s12 = int_to_ptr.vmem [resolvable:$true] %s17_s12 }
   0x3   :  { %s34_s15 = scalar_lea.hbm %s126_s0, 16 }
   0x4   :  { %p35_p0 = scmp.ne.s32.totalorder %s126_s0, %s34_s15  ;;  %p38_p1 = scmp.lt.u32.totalorder %s34_s15, %s126_s0 }
   0x6   :  { %p40_p2 = pnand %p38_p1, %p35_p0 }
   0x8   :  { %43 = shalt.err (!%p40_p2)
}
   0x9   :  { %s44_s20 = scalar_lea.vmem %s10_s10, 16  ;;  %s48_s21 = scalar_lea.vmem %s10_s10, 32 }
   0xa   :  { %p45_p3 = scmp.ne.s32.totalorder %s10_s10, %s44_s20  ;;  %p49_p4 = scmp.lt.s32.totalorder %s10_s10, %s10_s10 }
   0xb   :  { %p50_p5 = scmp.lt.s32.totalorder %s48_s21, %s44_s20 }
   0xd   :  { %p51_p6 = por %p50_p5, %p49_p4 }
   0xf   :  { %p52_p7 = pnand %p51_p6, %p45_p3 }
  0x11   :  { %55 = shalt.err (!%p52_p7)
}
  0x12   :  { %12 = dma.hbm_to_vmem [thread:$0]  %s126_s0, 16, %s10_s10, [#allocation1]  }
  0x13   :  { %s56_s25 = scalar_lea.hbm %s127_s1, 16 }
  0x14   :  { %p57_p8 = scmp.ne.s32.totalorder %s127_s1, %s56_s25  ;;  %p60_p9 = scmp.lt.u32.totalorder %s56_s25, %s127_s1 }
  0x16   :  { %p62_p10 = pnand %p60_p9, %p57_p8 }
  0x18   :  { %65 = shalt.err (!%p62_p10)
}
  0x19   :  { %s66_s30 = scalar_lea.vmem %s18_s12, 16  ;;  %s70_s3 = scalar_lea.vmem %s18_s12, 32 }
  0x1a   :  { %p67_p11 = scmp.ne.s32.totalorder %s18_s12, %s66_s30  ;;  %p71_p12 = scmp.lt.s32.totalorder %s18_s12, %s18_s12 }
  0x1b   :  { %p72_p13 = scmp.lt.s32.totalorder %s70_s3, %s66_s30 }
  0x1d   :  { %p73_p0 = por %p72_p13, %p71_p12 }
  0x1f   :  { %p74_p1 = pnand %p73_p0, %p67_p11 }
  0x21   :  { %77 = shalt.err (!%p74_p1)
}
  0x22   :  { %20 = dma.hbm_to_vmem [thread:$0]  %s127_s1, 16, %s18_s12, [#allocation3]  }
  0x23   :  { %78 = dma.done.wait [#allocation1], 16  }
  0x24   :  { %79 = vsyncadd [#allocation1], 4294967280 }
  0x25   :  { %80 = dma.done.wait [#allocation3], 16  }
  0x26   :  { %81 = vsyncadd [#allocation3], 4294967280  ;;  %v23_v0 = vld [vmem:[#allocation0] sm:$0x1]  ;;  %v24_v1 = vld [vmem:[#allocation2] sm:$0x1] }
  0x27   :  { %v27_v2 = vmul.f32 %v24_v1, %v23_v0 }
  0x29   :  { %29 = vst [vmem:[%s128_s2] sm:$0x1] %v27_v2 }
  0x2a   :  { %30 = vsyncpa [#allocation1], 1 }
  0x2b   :  { %31 = vsyncpa [#allocation3], 1 }

// kernel: consensus_pallas.1
= control target key start
LH: loop header
LB: loop body
LE: loop exit
PB: predicated region body
PF: predicated region fallthrough
CT: control target
= control target key end

     0   :  { %12 = vsyncpa [#allocation3], 0  ;;  %s1589_s0 = inlined_call_operand.vmem [shape: f32[1,32], index: 0, kind: input, shape index: {}]   ;;  %s1590_s1 = inlined_call_operand.vmem [shape: f32[1,16], index: 1, kind: input, shape index: {}]   ;;  %s1591_s2 = inlined_call_operand.vmem [shape: f32[32,64], index: 2, kind: input, shape index: {}]   ;;  %s1592_s3 = inlined_call_operand.vmem [shape: f32[1,1024], index: 3, kind: input, shape index: {}]   ;;  %s1593_s4 = inlined_call_operand.hbm [shape: bf16[112,256], index: 4, kind: input, shape index: {}]   ;;  %s1594_s5 = inlined_call_operand.vmem [shape: bf16[512,128], index: 5, kind: input, shape index: {}]   ;;  %s1595_s6 = inlined_call_operand.vmem [shape: bf16[256,64], index: 6, kind: input, shape index: {}]   ;;  %s1596_s7 = inlined_call_operand.hbm [shape: f32[1,128], index: 7, kind: output, shape index: {}]  }
   0x1   :  { %13 = vsyncpa [#allocation4], 0  ;;  %s1304_s24 = smov [#allocation2]   ;;  %s1256_s28 = scalar_lea.hbm %s1593_s4, 1792 }
   0x2   :  { %s27_s25 = sshll.u32 %s1304_s24, 4  ;;  %p1257_p0 = scmp.ne.s32.totalorder %s1593_s4, %s1256_s28  ;;  %s28_s25 = int_to_ptr.vmem [resolvable:$true] %s27_s25 }
   0x3   :  { %p1260_p1 = scmp.lt.u32.totalorder %s1256_s28, %s1593_s4 }
   0x5   :  { %p1262_p2 = pnand %p1260_p1, %p1257_p0 }
   0x7   :  { %1265 = shalt.err (!%p1262_p2)
}
   0x8   :  { %s1266_s10 = scalar_lea.vmem %s28_s25, 1792  ;;  %p1271_p4 = scmp.lt.s32.totalorder %s28_s25, %s28_s25 }
   0x9   :  { %p1267_p3 = scmp.ne.s32.totalorder %s28_s25, %s1266_s10  ;;  %p1272_p5 = scmp.lt.s32.totalorder %s1266_s10, %s1266_s10 }
   0xb   :  { %p1273_p6 = por %p1272_p5, %p1271_p4 }
   0xd   :  { %p1274_p7 = pnand %p1273_p6, %p1267_p3 }
   0xf   :  { %1277 = shalt.err (!%p1274_p7)
}
  0x10   :  { %s1305_s11 = smov 128   ;;  %s1306_s12 = smov 8  }
  0x11   :  { %33 = dma.hbm_to_vmem [thread:$0]  %s1593_s4, 1792, %s28_s25, [#allocation3], %s1305_s11, %s1305_s11, %s1306_s12  }
  0x12   :  { %1300 = dma.done.wait [#allocation3], 1792  }
  0x13   :  { %1301 = vsyncadd [#allocation3], 4294965504  ;;  %v1307_v0 = vmov 0   ;;  %v1179_v1 = vld [vmem:[#allocation2 + $0x4] ss:$8 sps:$4 sm:$0xff]   ;;  %v1182_v5 = vld [vmem:[%s1594_s5 + $0x40] sm:$0xff]   ;;  %v59_v28 = vlaneseq }
  0x14   :  { %105 = vmatprep.mubr.bf16.mxu0 %v1307_v0  ;;  %v1181_v2 = vld [vmem:[#allocation2] ss:$8 sps:$4 sm:$0xff]   ;;  %v44_v3 = vld [vmem:[%s1590_s1] sm:$0x1]  ;;  %73 = vmatprep.subr.bf16.mxu0 %v1179_v1  ;;  %vm69_vm0 = vcmask 130048   ;;  %v1188_v11 = vld [vmem:[%s1594_s5 + $0x58] sm:$0xff]  }
  0x15   :  { %v45_v4 = vpack.c.bf16 %v44_v3, %v44_v3  ;;  %74 = vmatpush1.bf16.msra.mxu0 %v1181_v2  ;;  %v1183_v6 = vld [vmem:[%s1594_s5] sm:$0xff]   ;;  %1046 = vmatprep.subr.bf16.mxu1 %v1182_v5  ;;  %v1184_v7 = vld [vmem:[%s1594_s5 + $0x48] sm:$0xff]   ;;  %v1186_v9 = vld [vmem:[%s1594_s5 + $0x50] sm:$0xff]   ;;  %v1308_v22 = vmov 0.0   ;;  %v1442_v29 = vshrl.u32 %v59_v28, 7  ;;  %vm1309_vm1 = vmmov 0  }
  0x16   :  { %1047 = vmatpush3.bf16.msra.mxu1 %v1183_v6  ;;  %v1185_v8 = vld [vmem:[%s1594_s5 + $0x8] sm:$0xff]   ;;  %v1187_v10 = vld [vmem:[%s1594_s5 + $0x10] sm:$0xff]   ;;  %v1189_v12 = vld [vmem:[%s1594_s5 + $0x18] sm:$0xff]   ;;  %1113 = vmatprep.subr.bf16.mxu0 %v1308_v22  ;;  %v1310_v60 = vmov 0.0|0.0   ;;  %vm412_vm2 = vcmask 261120   ;;  %vm540_vm3 = vcmask 523264  }
  0x17   :  { %1048 = vmatprep.subr.bf16.mxu1 %v1184_v7  ;;  %v1190_v13 = vld [vmem:[%s1594_s5 + $0x60] sm:$0xff]   ;;  %v1192_v15 = vld [vmem:[%s1594_s5 + $0x68] sm:$0xff]   ;;  %v1194_v17 = vld [vmem:[%s1594_s5 + $0x70] sm:$0xff]   ;;  %v61_v30 = vsub.s32 0, %v1442_v29  ;;  %v65_v32 = vsub.s32 1, %v1442_v29  ;;  %v248_v47 = vsub.s32 2, %v1442_v29 }
  0x18   :  { %980 = vmatmul.mubr.msk.bf16.vlgmr.msra.gmra.mrb[0].mxu0 %vm69_vm0, %v45_v4  ;;  %v1191_v14 = vld [vmem:[%s1594_s5 + $0x20] sm:$0xff]   ;;  %v1193_v16 = vld [vmem:[%s1594_s5 + $0x28] sm:$0xff]   ;;  %v1195_v18 = vld [vmem:[%s1594_s5 + $0x30] sm:$0xff]   ;;  %s1311_s19 = smov 64   ;;  %vm955_vm4 = vcmask 516096   ;;  %vm961_vm5 = vcmask 1040896  }
  0x19   :  { %v1196_v19 = vld [vmem:[%s1594_s5 + $0x78] sm:$0xff]   ;;  %v1198_v21 = vld [vmem:[%s1595_s6] sm:$0xff]   ;;  %v1199_v23 = vld [vmem:[%s1595_s6 + $0x8] sm:$0xff]   ;;  %1129 = vmatprep.mubr.msk.bf16.mxu0 %vm1309_vm1, %v1308_v22 }
  0x1a   :  { %1049 = vmatpush3.bf16.msra.mxu1 %v1185_v8  ;;  %v1197_v20 = vld [vmem:[%s1594_s5 + $0x38] sm:$0xff]   ;;  %1114 = vmatpush3.bf16.msra.mxu0 %v1198_v21  ;;  %v1200_v24 = vld [vmem:[%s1595_s6 + $0x10] sm:$0xff]   ;;  %v1202_v26 = vld [vmem:[%s1595_s6 + $0x20] sm:$0xff]  }
  0x1b   :  { %1050 = vmatprep.subr.bf16.mxu1 %v1186_v9  ;;  %1115 = vmatprep.subr.bf16.mxu0 %v1308_v22  ;;  %v1201_v25 = vld [vmem:[%s1595_s6 + $0x18] sm:$0xff]   ;;  %v1203_v27 = vld [vmem:[%s1595_s6 + $0x28] sm:$0xff]   ;;  %v1448_v31 = vld [vmem:[%s1592_s3] sm:$0xff] }
  0x1c   :  { %v62_v33 = vrot.slane %v1448_v31, %v61_v30  ;;  %v66_v34 = vrot.slane %v1448_v31, %v65_v32  ;;  %v1204_v45 = vld [vmem:[%s1595_s6 + $0x30] sm:$0xff]   ;;  %v1205_v46 = vld [vmem:[%s1595_s6 + $0x38] sm:$0xff]   ;;  %v249_v49 = vrot.slane %v1448_v31, %v248_v47  ;;  %v408_v57 = vld [vmem:[%s1591_s2] sm:$0xff] }
  0x1d   :  { %v409_v58 = vld [vmem:[%s1591_s2 + $0x8] sm:$0xff]  ;;  %v1208_v61 = vld [vmem:[#allocation2 + $0x34] ss:$8 sps:$4 sm:$0xff]   ;;  %v1206_v62 = vld [vmem:[#allocation2 + $0x30] ss:$8 sps:$4 sm:$0xff]  }
  0x1e   :  { %1051 = vmatpush3.bf16.msra.mxu1 %v1187_v10  ;;  %1116 = vmatpush3.bf16.msra.mxu0 %v1199_v23  ;;  %v1165_v59 = vpack.c.bf16 %v409_v58, %v408_v57  ;;  %v410_v63 = vld [vmem:[%s1591_s2 + $0x10] sm:$0xff]  ;;  %v411_v1 = vld [vmem:[%s1591_s2 + $0x18] sm:$0xff]  ;;  %v43_v7 = vld [vmem:[%s1589_s0] sm:$0x1]  ;;  %v651_v57 = vsub.s32 4, %v1442_v29  ;;  %v655_v58 = vsub.s32 5, %v1442_v29 }
  0x1f   :  { %1052 = vmatprep.subr.bf16.mxu1 %v1188_v11  ;;  %1117 = vmatprep.subr.bf16.mxu0 %v1308_v22  ;;  %v1168_v2 = vpack.c.bf16 %v411_v1, %v410_v63  ;;  %v1211_v3 = vld [vmem:[#allocation2 + $0x44] ss:$8 sps:$4 sm:$0xff]   ;;  %v1209_v4 = vld [vmem:[#allocation2 + $0x40] ss:$8 sps:$4 sm:$0xff]   ;;  %v1214_v5 = vld [vmem:[#allocation2 + $0x14] ss:$8 sps:$4 sm:$0xff]  }
  0x20   :  { %v1212_v6 = vld [vmem:[#allocation2 + $0x10] ss:$8 sps:$4 sm:$0xff]   ;;  %v1217_v8 = vld [vmem:[#allocation2 + $0x54] ss:$8 sps:$4 sm:$0xff]   ;;  %v1220_v10 = vld [vmem:[#allocation2 + $0x24] ss:$8 sps:$4 sm:$0xff]  }
  0x21   :  { %v1215_v9 = vld [vmem:[#allocation2 + $0x50] ss:$8 sps:$4 sm:$0xff]   ;;  %v1218_v11 = vld [vmem:[#allocation2 + $0x20] ss:$8 sps:$4 sm:$0xff]  }
  0x22   :  { %1053 = vmatpush3.bf16.msra.mxu1 %v1189_v12  ;;  %1118 = vmatpush3.bf16.msra.mxu0 %v1200_v24  ;;  %v1223_v12 = vld [vmem:[#allocation2 + $0x64] ss:$8 sps:$4 sm:$0xff]   ;;  %v1231_v21 = vld [vmem:[%s1594_s5 + $0x98] sm:$0xff]   ;;  %v1232_v23 = vld [vmem:[%s1594_s5 + $0xe0] sm:$0xff]  }
  0x23   :  { %1054 = vmatprep.subr.bf16.mxu1 %v1190_v13  ;;  %1119 = vmatprep.subr.bf16.mxu0 %v1308_v22  ;;  %v486_v13 = vpack.c.bf16 %v43_v7, %v43_v7  ;;  %v1233_v24 = vld [vmem:[%s1594_s5 + $0xa0] sm:$0xff]   ;;  %v1236_v47 = vld [vmem:[%s1594_s5 + $0xf0] sm:$0xff]  }
  0x26   :  { %1055 = vmatpush3.bf16.msra.mxu1 %v1191_v14  ;;  %1120 = vmatpush3.bf16.msra.mxu0 %v1201_v25  ;;  %v1221_v14 = vld [vmem:[#allocation2 + $0x60] ss:$8 sps:$4 sm:$0xff]  }
  0x27   :  { %1056 = vmatprep.subr.bf16.mxu1 %v1192_v15  ;;  %1121 = vmatprep.subr.bf16.mxu0 %v1308_v22  ;;  %v1224_v15 = vld [vmem:[%s1594_s5 + $0xc0] sm:$0xff]   ;;  %v1234_v25 = vld [vmem:[%s1594_s5 + $0xe8] sm:$0xff]  }
  0x2a   :  { %1057 = vmatpush3.bf16.msra.mxu1 %v1193_v16  ;;  %1122 = vmatpush3.bf16.msra.mxu0 %v1202_v26  ;;  %v1226_v16 = vld [vmem:[%s1594_s5 + $0xc8] sm:$0xff]   ;;  %v359_v26 = vsub.s32 3, %v1442_v29 }
  0x2b   :  { %1058 = vmatprep.subr.bf16.mxu1 %v1194_v17  ;;  %1123 = vmatprep.subr.bf16.mxu0 %v1308_v22  ;;  %v1227_v17 = vld [vmem:[%s1594_s5 + $0x88] sm:$0xff]  }
  0x2e   :  { %1059 = vmatpush3.bf16.msra.mxu1 %v1195_v18  ;;  %1124 = vmatpush3.bf16.msra.mxu0 %v1203_v27  ;;  %v1228_v18 = vld [vmem:[%s1594_s5 + $0xd0] sm:$0xff]   ;;  %v360_v27 = vrot.slane %v1448_v31, %v359_v26 }
  0x2f   :  { %1060 = vmatprep.subr.bf16.mxu1 %v1196_v19  ;;  %1125 = vmatprep.subr.bf16.mxu0 %v1308_v22  ;;  %v1229_v19 = vld [vmem:[%s1594_s5 + $0x90] sm:$0xff]  }
  0x32   :  { %1061 = vmatpush3.bf16.msra.mxu1 %v1197_v20  ;;  %1126 = vmatpush3.bf16.msra.mxu0 %v1204_v45  ;;  %v1230_v20 = vld [vmem:[%s1594_s5 + $0xd8] sm:$0xff]  }
  0x33   :  { %1127 = vmatprep.subr.bf16.mxu0 %v1308_v22  ;;  %1164 = vmatprep.subr.bf16.mxu1 %v1310_v60 }
  0x36   :  { %1128 = vmatpush3.bf16.msra.mxu0 %v1205_v46 }
  0x37   :  { %544 = vmatprep.subr.bf16.mxu0 %v1208_v61  ;;  %v656_v61 = vrot.slane %v1448_v31, %v655_v58 }
  0xeb   :  { %v107_v35 = vpop.f32.mrb[0].mxu0 }
  0xec   :  { %v108_v36 = vadd.f32 %v107_v35, %v62_v33  ;;  %v109_v37 = vpop.f32.mrb[1].mxu0 }
  0xed   :  { %v110_v38 = vadd.f32 %v109_v37, %v66_v34  ;;  %v111_v39 = vpop.f32.mrb[2].mxu0 }
  0xee   :  { %v114_v40 = vmax.f32 %v108_v36, 0.0  ;;  %v112_v41 = vpop.f32.mrb[3].mxu0 }
  0xef   :  { %v115_v42 = vmax.f32 %v110_v38, 0.0 }
  0xf0   :  { %v116_v44 = vpack.c.bf16 %v114_v40, %v114_v40 }
  0xf1   :  { %v117_v43 = vpack.c.bf16 %v115_v42, %v115_v42 }
  0xf3   :  { %283 = vmatprep.mubr.bf16.mxu1 %v117_v43  ;;  %v1235_v43 = vld [vmem:[%s1594_s5 + $0xa8] sm:$0xff]  }
  0xf4   :  { %284 = vmatmul.mubr.bf16.vlgmr.msra.gmra.mrb[0].mxu1 %v116_v44 }
  0xf5   :  { %1141 = vmatprep.mubr.msk.f32.mxu1 %vm1309_vm1, %v1308_v22  ;;  %1166 = vmatpush3.bf16.msra.mxu1 %v1165_v59  ;;  %v652_v59 = vrot.slane %v1448_v31, %v651_v57 }
  0xf6   :  { %1167 = vmatprep.subr.bf16.mxu1 %v1310_v60 }
  0xf9   :  { %1169 = vmatpush3.bf16.msra.mxu1 %v1168_v2 }
  0xfa   :  { %608 = vmatprep.subr.bf16.mxu1 %v1214_v5 }
  0xfc   :  { %1142 = vmatmul.mubr.msk.f32.vlgmr.msra.gmra.mrb[4].mxu1 %vm412_vm2, %v43_v7 }
  0xfd   :  { %609 = vmatpush1.bf16.msra.mxu1 %v1212_v6  ;;  %640 = vmatprep.mubr.bf16.mxu1 %v1307_v0 }
  0xfe   :  { %610 = vmatprep.subr.bf16.mxu1 %v1220_v10  ;;  %v1246_v10 = vld [vmem:[%s1595_s6 + $0x70] sm:$0xff]  }
 0x101   :  { %611 = vmatpush1.bf16.msra.mxu1 %v1218_v11  ;;  %v1247_v11 = vld [vmem:[%s1595_s6 + $0x78] sm:$0xff]  }
 0x102   :  { %1082 = vmatprep.subr.bf16.mxu1 %v1224_v15 }
 0x104   :  { %1020 = vmatmul.mubr.msk.bf16.vlgmr.msra.gmra.mrb[8].mxu1 %vm412_vm2, %v486_v13 }
 0x1c7   :  { %v1062_v48 = vpop.f32.mrb[0].mxu1 }
 0x1c8   :  { %v1063_v50 = vpop.f32.mrb[1].mxu1 }
 0x1c9   :  { %v1064_v51 = vadd.f32 %v1063_v50, %v1062_v48  ;;  %v1065_v52 = vpop.f32.mrb[2].mxu1  ;;  %v1237_v48 = vld [vmem:[%s1594_s5 + $0xb0] sm:$0xff]   ;;  %v1239_v50 = vld [vmem:[%s1594_s5 + $0xb8] sm:$0xff]  }
 0x1ca   :  { %v1066_v53 = vpop.f32.mrb[3].mxu1  ;;  %v1241_v52 = vld [vmem:[%s1595_s6 + $0x48] sm:$0xff]  }
 0x1cb   :  { %v286_v54 = vadd.f32 %v1064_v51, %v249_v49  ;;  %v1238_v49 = vld [vmem:[%s1594_s5 + $0xf8] sm:$0xff]   ;;  %v1240_v51 = vld [vmem:[%s1595_s6 + $0x40] sm:$0xff]   ;;  %v1242_v53 = vld [vmem:[%s1595_s6 + $0x50] sm:$0xff]  }
 0x1cd   :  { %v291_v55 = vmax.f32 %v286_v54, 0.0  ;;  %v1243_v54 = vld [vmem:[%s1595_s6 + $0x58] sm:$0xff]  }
 0x1cf   :  { %v292_v56 = vpack.c.bf16 %v291_v55, %v291_v55  ;;  %v482_v40 = vpop.f32.mrb[4].mxu1  ;;  %v1244_v55 = vld [vmem:[%s1595_s6 + $0x60] sm:$0xff]  }
 0x1d0   :  { %v1143_v41 = vpop.f32.mrb[5].mxu1  ;;  %958 = vrot.lane.b32.xlu0 %v482_v40, %s1311_s19 }
 0x1d1   :  { %1130 = vmatmul.mubr.bf16.vlgmr.msra.gmra.mrb[4].mxu0 %v292_v56  ;;  %v1245_v56 = vld [vmem:[%s1595_s6 + $0x68] sm:$0xff]   ;;  %s1312_s6 = smov [#allocation5]  }
 0x1d2   :  { %576 = vmatprep.mubr.bf16.mxu0 %v1307_v0  ;;  %545 = vmatpush1.bf16.msra.mxu0 %v1206_v62  ;;  %v1225_v0 = vld [vmem:[%s1594_s5 + $0x80] sm:$0xff]   ;;  %s969_s18 = sshll.u32 %s1312_s6, 4  ;;  %s970_s18 = int_to_ptr.vmem [resolvable:$true] %s969_s18 }
 0x1d3   :  { %546 = vmatprep.subr.bf16.mxu0 %v1211_v3  ;;  %1083 = vmatpush3.bf16.msra.mxu1 %v1225_v0  ;;  %s1278_s4 = scalar_lea.vmem %s970_s18, 16  ;;  %s1282_s19 = scalar_lea.vmem %s970_s18, 32 }
 0x1d4   :  { %1084 = vmatprep.subr.bf16.mxu1 %v1226_v16  ;;  %p1279_p8 = scmp.ne.s32.totalorder %s970_s18, %s1278_s4  ;;  %p1283_p9 = scmp.lt.s32.totalorder %s970_s18, %s970_s18 }
 0x1d5   :  { %p1284_p10 = scmp.lt.s32.totalorder %s1282_s19, %s1278_s4 }
 0x1d6   :  { %547 = vmatpush1.bf16.msra.mxu0 %v1209_v4 }
 0x1d7   :  { %548 = vmatprep.subr.bf16.mxu0 %v1217_v8  ;;  %1085 = vmatpush3.bf16.msra.mxu1 %v1227_v17  ;;  %v642_v42 = vpop.f32.mrb[8].mxu1  ;;  %p1285_p11 = por %p1284_p10, %p1283_p9 }
 0x1d8   :  { %1086 = vmatprep.subr.bf16.mxu1 %v1228_v18  ;;  %v644_v44 = vpop.f32.mrb[9].mxu1 }
 0x1d9   :  { %v646_v45 = vpop.f32.mrb[10].mxu1  ;;  %p1286_p12 = pnand %p1285_p11, %p1279_p8 }
 0x1da   :  { %549 = vmatpush1.bf16.msra.mxu0 %v1215_v9  ;;  %v647_v46 = vpop.f32.mrb[11].mxu1 }
 0x1db   :  { %550 = vmatprep.subr.bf16.mxu0 %v1223_v12  ;;  %1087 = vmatpush3.bf16.msra.mxu1 %v1229_v19  ;;  %v795_v12 = vsub.s32 6, %v1442_v29 }
 0x1dc   :  { %1088 = vmatprep.subr.bf16.mxu1 %v1230_v20 }
 0x1de   :  { %551 = vmatpush1.bf16.msra.mxu0 %v1221_v14  ;;  %v796_v14 = vrot.slane %v1448_v31, %v795_v12 }
 0x1df   :  { %1144 = vmatprep.subr.bf16.mxu0 %v1308_v22  ;;  %1089 = vmatpush3.bf16.msra.mxu1 %v1231_v21 }
 0x1e0   :  { %1090 = vmatprep.subr.bf16.mxu1 %v1232_v23 }
 0x1e3   :  { %1091 = vmatpush3.bf16.msra.mxu1 %v1233_v24 }
 0x1e4   :  { %1092 = vmatprep.subr.bf16.mxu1 %v1234_v25 }
 0x1e7   :  { %1093 = vmatpush3.bf16.msra.mxu1 %v1235_v43 }
 0x1e8   :  { %1094 = vmatprep.subr.bf16.mxu1 %v1236_v47 }
 0x1eb   :  { %1095 = vmatpush3.bf16.msra.mxu1 %v1237_v48 }
 0x1ec   :  { %1096 = vmatprep.subr.bf16.mxu1 %v1238_v49 }
 0x1ef   :  { %1097 = vmatpush3.bf16.msra.mxu1 %v1239_v50 }
 0x2a4   :  { %v396_v28 = vpop.f32.mrb[4].mxu0 }
 0x2a5   :  { %v397_v30 = vadd.f32 %v396_v28, %v360_v27  ;;  %v1131_v32 = vpop.f32.mrb[5].mxu0 }
 0x2a6   :  { %v399_v33 = vpop.f32.mrb[6].mxu0 }
 0x2a7   :  { %v1005_v34 = vmul.f32 -1.442695, %v397_v30  ;;  %v1132_v35 = vpop.f32.mrb[7].mxu0 }
 0x2a9   :  { %1248 = vpow2.f32 %v1005_v34  ;;  %v959_v34 = vpop.permute.xlu0 %958 }
 0x2b3   :  { %v1249_v36 = vpop.eup %1248 }
 0x2b4   :  { %v405_v37 = vadd.f32 1.0, %v1249_v36 }
 0x2b6   :  { %1250 = vrcp.f32 %v405_v37 }
 0x2c0   :  { %v1251_v38 = vpop.eup %1250 }
 0x2c1   :  { %v491_v39 = vpack.c.bf16 %v1251_v38, %v1251_v38 }
 0x2c3   :  { %1015 = vmatmul.mubr.msk.bf16.vlgmr.msra.gmra.mrb[8].mxu0 %vm540_vm3, %v491_v39 }
 0x2c4   :  { %1160 = vmatprep.mubr.msk.bf16.mxu0 %vm1309_vm1, %v1308_v22  ;;  %1145 = vmatpush3.bf16.msra.mxu0 %v1240_v51 }
 0x2c5   :  { %1146 = vmatprep.subr.bf16.mxu0 %v1308_v22 }
 0x2c8   :  { %1147 = vmatpush3.bf16.msra.mxu0 %v1241_v52 }
 0x2c9   :  { %1148 = vmatprep.subr.bf16.mxu0 %v1308_v22 }
 0x2cc   :  { %1149 = vmatpush3.bf16.msra.mxu0 %v1242_v53 }
 0x2cd   :  { %1150 = vmatprep.subr.bf16.mxu0 %v1308_v22 }
 0x2d0   :  { %1151 = vmatpush3.bf16.msra.mxu0 %v1243_v54 }
 0x2d1   :  { %1152 = vmatprep.subr.bf16.mxu0 %v1308_v22 }
 0x2d4   :  { %1153 = vmatpush3.bf16.msra.mxu0 %v1244_v55 }
 0x2d5   :  { %1154 = vmatprep.subr.bf16.mxu0 %v1308_v22 }
 0x2d8   :  { %1155 = vmatpush3.bf16.msra.mxu0 %v1245_v56 }
 0x2d9   :  { %1156 = vmatprep.subr.bf16.mxu0 %v1308_v22 }
 0x2dc   :  { %1157 = vmatpush3.bf16.msra.mxu0 %v1246_v10 }
 0x2dd   :  { %1158 = vmatprep.subr.bf16.mxu0 %v1308_v22  ;;  %v906_v22 = vsub.s32 7, %v1442_v29 }
 0x2df   :  { %v907_v21 = vrot.slane %v1448_v31, %v906_v22 }
 0x2e0   :  { %1159 = vmatpush3.bf16.msra.mxu0 %v1247_v11 }
 0x396   :  { %v578_v60 = vpop.f32.mrb[8].mxu0 }
 0x397   :  { %v643_v62 = vadd.f32 %v642_v42, %v578_v60  ;;  %v580_v63 = vpop.f32.mrb[9].mxu0 }
 0x398   :  { %v645_v1 = vadd.f32 %v644_v44, %v580_v63  ;;  %v582_v2 = vpop.f32.mrb[10].mxu0 }
 0x399   :  { %v659_v3 = vadd.f32 %v652_v59, %v643_v62  ;;  %v583_v4 = vpop.f32.mrb[11].mxu0 }
 0x39a   :  { %v660_v5 = vadd.f32 %v656_v61, %v645_v1 }
 0x39b   :  { %v661_v6 = vmax.f32 %v659_v3, 0.0 }
 0x39c   :  { %v662_v7 = vmax.f32 %v660_v5, 0.0 }
 0x39d   :  { %v663_v9 = vpack.c.bf16 %v661_v6, %v661_v6 }
 0x39e   :  { %v664_v8 = vpack.c.bf16 %v662_v7, %v662_v7 }
 0x3a0   :  { %830 = vmatprep.mubr.bf16.mxu1 %v664_v8 }
 0x3a1   :  { %831 = vmatmul.mubr.bf16.vlgmr.msra.gmra.mrb[12].mxu1 %v663_v9 }
 0x474   :  { %v1098_v13 = vpop.f32.mrb[12].mxu1 }
 0x475   :  { %v1099_v15 = vpop.f32.mrb[13].mxu1 }
 0x476   :  { %v1100_v0 = vadd.f32 %v1099_v15, %v1098_v13  ;;  %v1101_v16 = vpop.f32.mrb[14].mxu1 }
 0x477   :  { %v1102_v17 = vpop.f32.mrb[15].mxu1 }
 0x478   :  { %v833_v18 = vadd.f32 %v1100_v0, %v796_v14 }
 0x47a   :  { %v838_v19 = vmax.f32 %v833_v18, 0.0 }
 0x47c   :  { %v839_v20 = vpack.c.bf16 %v838_v19, %v838_v19 }
 0x47e   :  { %1161 = vmatmul.mubr.bf16.vlgmr.msra.gmra.mrb[12].mxu0 %v839_v20 }
 0x551   :  { %v943_v23 = vpop.f32.mrb[12].mxu0 }
 0x552   :  { %v944_v24 = vadd.f32 %v943_v23, %v907_v21  ;;  %v1162_v25 = vpop.f32.mrb[13].mxu0 }
 0x553   :  { %v946_v26 = vpop.f32.mrb[14].mxu0 }
 0x554   :  { %v1045_v27 = vmul.f32 -1.442695, %v944_v24  ;;  %v1163_v28 = vpop.f32.mrb[15].mxu0 }
 0x556   :  { %1252 = vpow2.f32 %v1045_v27 }
 0x560   :  { %v1253_v30 = vpop.eup %1252 }
 0x561   :  { %v952_v32 = vadd.f32 1.0, %v1253_v30 }
 0x563   :  { %1254 = vrcp.f32 %v952_v32 }
 0x56d   :  { %v1255_v33 = vpop.eup %1254 }
 0x56e   :  { %956 = vst.msk [vmem:[#allocation5] sm:$0x1] %vm955_vm4, %v1255_v33 }
 0x56f   :  { %962 = vst.msk [vmem:[#allocation5] sm:$0x1] %vm961_vm5, %v959_v34 }
 0x570   :  { %1289 = shalt.err (!%p1286_p12)
}
 0x571   :  { %s1290_s22 = scalar_lea.hbm %s1596_s7, 16 }
 0x572   :  { %p1291_p13 = scmp.ne.s32.totalorder %s1596_s7, %s1290_s22  ;;  %p1294_p0 = scmp.lt.u32.totalorder %s1290_s22, %s1596_s7 }
 0x574   :  { %p1296_p1 = pnand %p1294_p0, %p1291_p13 }
 0x576   :  { %1299 = shalt.err (!%p1296_p1)
}
 0x577   :  { %972 = dma.vmem_to_hbm [thread:$0]  %s970_s18, 16, %s1596_s7, [#allocation4]  }
 0x578   :  { %1302 = dma.done.wait [#allocation4], 16  }
 0x579   :  { %1303 = vsyncadd [#allocation4], 4294967280 }
 0x57a   :  { %976 = vsyncpa [#allocation3], 1 }
 0x57b   :  { %977 = vsyncpa [#allocation4], 1 }

</bundles_post_ra>
